<compile_context>
chip_gen: v6e
topology: v6e:2x2x1
jax: 0.10.0
libtpu: 0.0.40
codegen_flags: <defaults>
</compile_context>

<pallas_src>
import functools

import jax
import jax.numpy as jnp
import numpy as np
from jax.experimental import pallas as pl
from jax.experimental.pallas import tpu as pltpu


def _dice_partial_kernel(p_ref, t_ref, num_out_ref, den_out_ref, num_acc, den_acc,
                         *, p_exp, tgt_is_float):
    # p_ref / t_ref: (C, TR, LANE) block for one (batch, spatial-tile) slab.
    n = pl.program_id(1)
    rb = pl.program_id(2)
    n_last = pl.num_programs(1) - 1
    rb_last = pl.num_programs(2) - 1

    @pl.when(jnp.logical_and(n == 0, rb == 0))
    def _init():
        num_acc[...] = jnp.zeros_like(num_acc)
        den_acc[...] = jnp.zeros_like(den_acc)

    logits = p_ref[...].astype(jnp.float32)          # (C, TR, LANE)
    t = t_ref[...].astype(jnp.float32)
    if tgt_is_float:
        # torch `.type(torch.LongTensor)` truncates toward zero.
        t = jnp.where(t >= 0.0, jnp.floor(t), jnp.ceil(t))

    # Softmax over channels: C is the leading slab axis -> elementwise VPU
    # max/sum across slabs, EUP approximate reciprocal instead of a divide.
    m = jnp.max(logits, axis=0, keepdims=True)       # (1, TR, LANE)
    e = jnp.exp(logits - m)
    s = jnp.sum(e, axis=0, keepdims=True)            # >= 1, safe for approx recip
    sm = e * pl.reciprocal(s, approx=True)

    # Pure elementwise accumulation per tile; reduce once at the end.
    num_acc[...] += sm * t
    if p_exp == 2:
        den_acc[...] += sm * sm + t * t
    else:
        den_acc[...] += sm ** p_exp + t ** p_exp

    @pl.when(jnp.logical_and(n == n_last, rb == rb_last))
    def _finalize():
        # One XLU lane reduce + one sublane reduce per class, once per grid slice.
        red_num = jnp.sum(jnp.sum(num_acc[...], axis=2), axis=1)   # (C,)
        red_den = jnp.sum(jnp.sum(den_acc[...], axis=2), axis=1)   # (C,)
        num_out_ref[...] = red_num.reshape(num_out_ref.shape)
        den_out_ref[...] = red_den.reshape(den_out_ref.shape)


def _choose_tiling(N, C, R, target_itemsize):
    """Pick spatial tile rows + a 2-way work split for the leading grid axis."""
    # Per 128-lane row of one tile: double-buffered predict(f32)+target inputs
    # plus two f32 accumulators. Keep under ~10 MiB so the default scoped VMEM
    # limit is enough on all generations (v7x has only 64 MiB physical VMEM).
    per_row = C * 128 * (2 * (4 + target_itemsize) + 2 * 4)
    budget = 10 * 1024 * 1024
    max_tr = min(512, max(8, budget // max(per_row, 1)))
    max_tr -= max_tr % 8
    max_tr = max(max_tr, 8)

    if R <= max_tr:
        tr = R
    else:
        tr = None
        for cand in range(max_tr, 7, -8):
            if R % cand == 0:
                tr = cand
                break
        if tr is None:
            # TODO(synk): no multiple-of-8 divisor of R fits the budget; fall back to full extent.
            tr = R
    rb_total = R // tr

    # Split work 2 ways across a leading "parallel" grid axis (both v7x TCs).
    if N % 2 == 0:
        g, n_inner, rb_inner, split_n = 2, N // 2, rb_total, True
    elif rb_total % 2 == 0:
        g, n_inner, rb_inner, split_n = 2, N, rb_total // 2, False
    else:
        g, n_inner, rb_inner, split_n = 1, N, rb_total, True
    return tr, g, n_inner, rb_inner, split_n


def dice_loss_v2(predict, target, *, smooth=1.0, p=2, ignore_index=None, weight=None):
    """Matches DiceLoss_v2.forward(predict, target) with default kwargs.

    predict: [N, C, *spatial] float logits
    target : same shape (any numeric dtype; cast like torch LongTensor, i.e. truncated)
    """
    assert predict.shape == target.shape, "predict & target shape do not match"
    # TODO(synk): weight path not implemented (reference code references undefined self.weights).
    assert weight is None

    predict = jnp.asarray(predict)
    target = jnp.asarray(target)

    N, C = predict.shape[0], predict.shape[1]
    S = int(np.prod(predict.shape[2:])) if predict.ndim > 2 else 1

    if S % 128 == 0 and S > 0:
        lane = 128
    else:
        # TODO(synk): non-multiple-of-128 spatial size falls back to one lane-wide block per batch.
        lane = S
    R = S // lane

    pr = predict.reshape(N, C, R, lane)              # free reshape, no transpose/cast pass
    tg = target.reshape(N, C, R, lane)               # original dtype; truncation done in-kernel

    tr, g, n_inner, rb_inner, split_n = _choose_tiling(
        N, C, R, jnp.dtype(tg.dtype).itemsize)

    if split_n:
        in_map = lambda gi, ni, ri: (gi * n_inner + ni, 0, ri, 0)
    else:
        in_map = lambda gi, ni, ri: (ni, 0, gi * rb_inner + ri, 0)
    out_map = lambda gi, ni, ri: (gi, 0, 0)

    tgt_is_float = bool(jnp.issubdtype(tg.dtype, jnp.floating))

    num_part, den_part = pl.pallas_call(
        functools.partial(_dice_partial_kernel, p_exp=p, tgt_is_float=tgt_is_float),
        out_shape=(jax.ShapeDtypeStruct((g, 1, C), jnp.float32),
                   jax.ShapeDtypeStruct((g, 1, C), jnp.float32)),
        grid_spec=pltpu.PrefetchScalarGridSpec(
            num_scalar_prefetch=0,
            grid=(g, n_inner, rb_inner),
            in_specs=[pl.BlockSpec((None, C, tr, lane), in_map),
                      pl.BlockSpec((None, C, tr, lane), in_map)],
            out_specs=[pl.BlockSpec((None, 1, C), out_map),
                       pl.BlockSpec((None, 1, C), out_map)],
            scratch_shapes=[pltpu.VMEM((C, tr, lane), jnp.float32),
                            pltpu.VMEM((C, tr, lane), jnp.float32)],
        ),
        compiler_params=pltpu.CompilerParams(
            dimension_semantics=("parallel", "arbitrary", "arbitrary")),
    )(pr, tg)

    # Tiny finalize in plain JAX: combine partial sums, apply ignore_index mask.
    num = jnp.sum(num_part, axis=(0, 1))             # (C,)
    den = jnp.sum(den_part, axis=(0, 1))             # (C,)

    mask = np.ones((C,), dtype=np.float32)
    if ignore_index is not None and 0 <= ignore_index < C:
        mask[ignore_index] = 0.0
    mask = jnp.asarray(mask)

    per_class_loss = (1.0 - (2.0 * num + smooth) / (den + smooth)) * mask
    return jnp.sum(per_class_loss) / C               # divide by C incl. ignored class (as in torch)


def _reference_jax(predict, target, smooth=1.0, p=2, ignore_index=None):
    # pure-JAX reference mirroring the PyTorch code
    N, C = predict.shape[0], predict.shape[1]
    sm = jax.nn.softmax(jnp.asarray(predict, jnp.float32), axis=1)
    tgt = jnp.trunc(jnp.asarray(target).astype(jnp.float32))
    total = 0.0
    for i in range(C):
        if i == ignore_index:
            continue
        pi = sm[:, i].reshape(N, -1)
        ti = tgt[:, i].reshape(N, -1)
        num = jnp.sum(pi * ti) * 2 + smooth
        den = jnp.sum(pi ** p + ti ** p) + smooth
        total = total + (1 - num / den)
    return total / C


if __name__ == "__main__":
    key = jax.random.PRNGKey(0)
    k1, k2 = jax.random.split(key)
    N, C, H, W = 2, 4, 16, 16

    predict = jax.random.normal(k1, (N, C, H, W), dtype=jnp.float32)
    # one-hot style target (as DiceLoss_v2 docstring requires); int8/bf16 targets also accepted.
    labels = jax.random.randint(k2, (N, H, W), 0, C)
    target = jax.nn.one_hot(labels, C, axis=1).astype(jnp.float32)   # [N, C, H, W]

    loss = dice_loss_v2(predict, target)
    loss = jax.block_until_ready(loss)

    ref = _reference_jax(predict, target)
    # tolerance covers the approximate-reciprocal softmax normalization
    assert np.allclose(np.asarray(loss), np.asarray(ref), rtol=3e-3, atol=3e-3), (loss, ref)
    print("KERNEL_OK")
</pallas_src>

<mosaic_0001>
module attributes {stable_mosaic.version = 11 : i64} {
  func.func @_dice_partial_kernel(%arg0: i32, %arg1: i32, %arg2: i32, %arg3: memref<1x4x2x128xf32, #tpu.memory_space<vmem>>, %arg4: memref<1x4x2x128xf32, #tpu.memory_space<vmem>>, %arg5: memref<1x1x4xf32, #tpu.memory_space<vmem>>, %arg6: memref<1x1x4xf32, #tpu.memory_space<vmem>>, %arg7: memref<4x2x128xf32, #tpu.memory_space<vmem>>, %arg8: memref<4x2x128xf32, #tpu.memory_space<vmem>>) attributes {dimension_semantics = [#tpu.dimension_semantics<parallel>, #tpu.dimension_semantics<arbitrary>, #tpu.dimension_semantics<arbitrary>], iteration_bounds = array<i64: 2, 1, 1>, scalar_prefetch = 0 : i64, scratch_operands = 2 : i64, tpu.core_type = #tpu.core_type<tc>, window_params = [{transform_indices = @transform_0, window_bounds = array<i64: 1, 4, 2, 128>}, {transform_indices = @transform_1, window_bounds = array<i64: 1, 4, 2, 128>}, {transform_indices = @transform_2, window_bounds = array<i64: 1, 1, 4>}, {transform_indices = @transform_3, window_bounds = array<i64: 1, 1, 4>}]} {
    %c0_i32 = arith.constant 0 : i32
    %0 = arith.cmpi eq, %arg1, %c0_i32 : i32
    %c0_i32_0 = arith.constant 0 : i32
    %1 = arith.cmpi eq, %arg2, %c0_i32_0 : i32
    %2 = arith.andi %0, %1 : i1
    %3 = arith.extui %2 : i1 to i32
    %c0_i32_1 = arith.constant 0 : i32
    %4 = arith.cmpi ne, %3, %c0_i32_1 : i32
    scf.if %4 {
      %cst_26 = arith.constant 0.000000e+00 : f32
      %39 = vector.broadcast %cst_26 : f32 to vector<4x2x128xf32>
      %c0_27 = arith.constant 0 : index
      %c0_28 = arith.constant 0 : index
      %c0_29 = arith.constant 0 : index
      %40 = vector.load %arg7[%c0_27, %c0_28, %c0_29] : memref<4x2x128xf32, #tpu.memory_space<vmem>>, vector<4x2x128xf32>
      tpu.vector_store %arg7[%c0_27, %c0_28, %c0_29], %39 {strides = array<i32>} : memref<4x2x128xf32, #tpu.memory_space<vmem>>, vector<4x2x128xf32>,
      %cst_30 = arith.constant 0.000000e+00 : f32
      %41 = vector.broadcast %cst_30 : f32 to vector<4x2x128xf32>
      %c0_31 = arith.constant 0 : index
      %c0_32 = arith.constant 0 : index
      %c0_33 = arith.constant 0 : index
      %42 = vector.load %arg8[%c0_31, %c0_32, %c0_33] : memref<4x2x128xf32, #tpu.memory_space<vmem>>, vector<4x2x128xf32>
      tpu.vector_store %arg8[%c0_31, %c0_32, %c0_33], %41 {strides = array<i32>} : memref<4x2x128xf32, #tpu.memory_space<vmem>>, vector<4x2x128xf32>,
    } else {
    }
    %c0 = arith.constant 0 : index
    %c0_2 = arith.constant 0 : index
    %c0_3 = arith.constant 0 : index
    %c0_4 = arith.constant 0 : index
    %5 = vector.load %arg3[%c0, %c0_2, %c0_3, %c0_4] : memref<1x4x2x128xf32, #tpu.memory_space<vmem>>, vector<1x4x2x128xf32>
    %6 = vector.shape_cast %5 : vector<1x4x2x128xf32> to vector<4x2x128xf32>
    %c0_5 = arith.constant 0 : index
    %c0_6 = arith.constant 0 : index
    %c0_7 = arith.constant 0 : index
    %c0_8 = arith.constant 0 : index
    %7 = vector.load %arg4[%c0_5, %c0_6, %c0_7, %c0_8] : memref<1x4x2x128xf32, #tpu.memory_space<vmem>>, vector<1x4x2x128xf32>
    %8 = vector.shape_cast %7 : vector<1x4x2x128xf32> to vector<4x2x128xf32>
    %cst = arith.constant 0.000000e+00 : f32
    %9 = vector.broadcast %cst : f32 to vector<4x2x128xf32>
    %10 = arith.cmpf oge, %8, %9 : vector<4x2x128xf32>
    %11 = math.floor %8 : vector<4x2x128xf32>
    %12 = math.ceil %8 : vector<4x2x128xf32>
    %13 = arith.select %10, %11, %12 : vector<4x2x128xi1>, vector<4x2x128xf32>
    %cst_9 = arith.constant dense<0xFF800000> : vector<2x128xf32>
    %14 = vector.multi_reduction <maximumf>, %6, %cst_9 [0] : vector<4x2x128xf32> to vector<2x128xf32>
    %15 = vector.shape_cast %14 : vector<2x128xf32> to vector<1x2x128xf32>
    %16 = vector.broadcast %15 : vector<1x2x128xf32> to vector<4x2x128xf32>
    %17 = arith.subf %6, %16 : vector<4x2x128xf32>
    %18 = math.exp %17 : vector<4x2x128xf32>
    %cst_10 = arith.constant dense<0.000000e+00> : vector<2x128xf32>
    %19 = vector.multi_reduction <add>, %18, %cst_10 [0] : vector<4x2x128xf32> to vector<2x128xf32>
    %20 = vector.shape_cast %19 : vector<2x128xf32> to vector<1x2x128xf32>
    %21 = tpu.reciprocal %20 {approx = true} : vector<1x2x128xf32> -> vector<1x2x128xf32>
    %22 = vector.broadcast %21 : vector<1x2x128xf32> to vector<4x2x128xf32>
    %23 = arith.mulf %18, %22 : vector<4x2x128xf32>
    %c0_11 = arith.constant 0 : index
    %c0_12 = arith.constant 0 : index
    %c0_13 = arith.constant 0 : index
    %24 = vector.load %arg7[%c0_11, %c0_12, %c0_13] : memref<4x2x128xf32, #tpu.memory_space<vmem>>, vector<4x2x128xf32>
    %25 = arith.mulf %23, %13 : vector<4x2x128xf32>
    %26 = arith.addf %24, %25 : vector<4x2x128xf32>
    %c0_14 = arith.constant 0 : index
    %c0_15 = arith.constant 0 : index
    %c0_16 = arith.constant 0 : index
    %27 = vector.load %arg7[%c0_14, %c0_15, %c0_16] : memref<4x2x128xf32, #tpu.memory_space<vmem>>, vector<4x2x128xf32>
    tpu.vector_store %arg7[%c0_14, %c0_15, %c0_16], %26 {strides = array<i32>} : memref<4x2x128xf32, #tpu.memory_space<vmem>>, vector<4x2x128xf32>,
    %c0_17 = arith.constant 0 : index
    %c0_18 = arith.constant 0 : index
    %c0_19 = arith.constant 0 : index
    %28 = vector.load %arg8[%c0_17, %c0_18, %c0_19] : memref<4x2x128xf32, #tpu.memory_space<vmem>>, vector<4x2x128xf32>
    %29 = arith.mulf %23, %23 : vector<4x2x128xf32>
    %30 = arith.mulf %13, %13 : vector<4x2x128xf32>
    %31 = arith.addf %29, %30 : vector<4x2x128xf32>
    %32 = arith.addf %28, %31 : vector<4x2x128xf32>
    %c0_20 = arith.constant 0 : index
    %c0_21 = arith.constant 0 : index
    %c0_22 = arith.constant 0 : index
    %33 = vector.load %arg8[%c0_20, %c0_21, %c0_22] : memref<4x2x128xf32, #tpu.memory_space<vmem>>, vector<4x2x128xf32>
    tpu.vector_store %arg8[%c0_20, %c0_21, %c0_22], %32 {strides = array<i32>} : memref<4x2x128xf32, #tpu.memory_space<vmem>>, vector<4x2x128xf32>,
    %c0_i32_23 = arith.constant 0 : i32
    %34 = arith.cmpi eq, %arg1, %c0_i32_23 : i32
    %c0_i32_24 = arith.constant 0 : i32
    %35 = arith.cmpi eq, %arg2, %c0_i32_24 : i32
    %36 = arith.andi %34, %35 : i1
    %37 = arith.extui %36 : i1 to i32
    %c0_i32_25 = arith.constant 0 : i32
    %38 = arith.cmpi ne, %37, %c0_i32_25 : i32
    scf.if %38 {
      %c0_26 = arith.constant 0 : index
      %c0_27 = arith.constant 0 : index
      %c0_28 = arith.constant 0 : index
      %39 = vector.load %arg7[%c0_26, %c0_27, %c0_28] : memref<4x2x128xf32, #tpu.memory_space<vmem>>, vector<4x2x128xf32>
      %cst_29 = arith.constant dense<0.000000e+00> : vector<4x2xf32>
      %40 = vector.multi_reduction <add>, %39, %cst_29 [2] : vector<4x2x128xf32> to vector<4x2xf32>
      %cst_30 = arith.constant dense<0.000000e+00> : vector<4xf32>
      %41 = vector.multi_reduction <add>, %40, %cst_30 [1] : vector<4x2xf32> to vector<4xf32>
      %c0_31 = arith.constant 0 : index
      %c0_32 = arith.constant 0 : index
      %c0_33 = arith.constant 0 : index
      %42 = vector.load %arg8[%c0_31, %c0_32, %c0_33] : memref<4x2x128xf32, #tpu.memory_space<vmem>>, vector<4x2x128xf32>
      %cst_34 = arith.constant dense<0.000000e+00> : vector<4x2xf32>
      %43 = vector.multi_reduction <add>, %42, %cst_34 [2] : vector<4x2x128xf32> to vector<4x2xf32>
      %cst_35 = arith.constant dense<0.000000e+00> : vector<4xf32>
      %44 = vector.multi_reduction <add>, %43, %cst_35 [1] : vector<4x2xf32> to vector<4xf32>
      %45 = vector.shape_cast %41 : vector<4xf32> to vector<1x4xf32>
      %c0_36 = arith.constant 0 : index
      %c0_37 = arith.constant 0 : index
      %c0_38 = arith.constant 0 : index
      %46 = vector.load %arg5[%c0_36, %c0_37, %c0_38] : memref<1x1x4xf32, #tpu.memory_space<vmem>>, vector<1x1x4xf32>
      %47 = vector.shape_cast %46 : vector<1x1x4xf32> to vector<1x4xf32>
      %48 = vector.shape_cast %45 : vector<1x4xf32> to vector<1x1x4xf32>
      tpu.vector_store %arg5[%c0_36, %c0_37, %c0_38], %48 {strides = array<i32>} : memref<1x1x4xf32, #tpu.memory_space<vmem>>, vector<1x1x4xf32>,
      %49 = vector.shape_cast %44 : vector<4xf32> to vector<1x4xf32>
      %c0_39 = arith.constant 0 : index
      %c0_40 = arith.constant 0 : index
      %c0_41 = arith.constant 0 : index
      %50 = vector.load %arg6[%c0_39, %c0_40, %c0_41] : memref<1x1x4xf32, #tpu.memory_space<vmem>>, vector<1x1x4xf32>
      %51 = vector.shape_cast %50 : vector<1x1x4xf32> to vector<1x4xf32>
      %52 = vector.shape_cast %49 : vector<1x4xf32> to vector<1x1x4xf32>
      tpu.vector_store %arg6[%c0_39, %c0_40, %c0_41], %52 {strides = array<i32>} : memref<1x1x4xf32, #tpu.memory_space<vmem>>, vector<1x1x4xf32>,
    } else {
    }
    return
  }
  func.func @transform_0(%arg0: i32, %arg1: i32, %arg2: i32) -> (i32, i32, i32, i32) {
    %c1_i32 = arith.constant 1 : i32
    %0 = arith.muli %arg0, %c1_i32 : i32
    %1 = arith.addi %0, %arg1 : i32
    %c0_i32 = arith.constant 0 : i32
    %c0_i32_0 = arith.constant 0 : i32
    %c0_i32_1 = arith.constant 0 : i32
    return %1, %c0_i32, %arg2, %c0_i32_0 : i32, i32, i32, i32
  }
  func.func @transform_1(%arg0: i32, %arg1: i32, %arg2: i32) -> (i32, i32, i32, i32) {
    %c1_i32 = arith.constant 1 : i32
    %0 = arith.muli %arg0, %c1_i32 : i32
    %1 = arith.addi %0, %arg1 : i32
    %c0_i32 = arith.constant 0 : i32
    %c0_i32_0 = arith.constant 0 : i32
    %c0_i32_1 = arith.constant 0 : i32
    return %1, %c0_i32, %arg2, %c0_i32_0 : i32, i32, i32, i32
  }
  func.func @transform_2(%arg0: i32, %arg1: i32, %arg2: i32) -> (i32, i32, i32) {
    %c0_i32 = arith.constant 0 : i32
    %c0_i32_0 = arith.constant 0 : i32
    %c0_i32_1 = arith.constant 0 : i32
    return %arg0, %c0_i32, %c0_i32_0 : i32, i32, i32
  }
  func.func @transform_3(%arg0: i32, %arg1: i32, %arg2: i32) -> (i32, i32, i32) {
    %c0_i32 = arith.constant 0 : i32
    %c0_i32_0 = arith.constant 0 : i32
    %c0_i32_1 = arith.constant 0 : i32
    return %arg0, %c0_i32, %c0_i32_0 : i32, i32, i32
  }
}

</mosaic_0001>

<bundles_post_ra>
// kernel: tpu_custom_call.1
= control target key start
LH: loop header
LB: loop body
LE: loop exit
PB: predicated region body
PF: predicated region fallthrough
CT: control target
= control target key end

     0   :  { %s1206_s0 = inlined_call_operand.hbm [shape: f32[2,4,2,128], index: 0, kind: input, shape index: {}]   ;;  %s1207_s1 = inlined_call_operand.hbm [shape: f32[2,4,2,128], index: 1, kind: input, shape index: {}]   ;;  %s1208_s2 = inlined_call_operand.hbm [shape: f32[2,1,4], index: 2, kind: output, shape index: {0}]   ;;  %s1209_s3 = inlined_call_operand.hbm [shape: f32[2,1,4], index: 3, kind: output, shape index: {1}]  }
   0x1   :  { %1210 = sst [smem:[#allocation16_spill]] %s1206_s0 }
   0x2   :  { %9 = vsyncpa [#allocation5], 0 }
   0x3   :  { %11 = vsyncpa [#allocation5 + $0x1], 0 }
   0x4   :  { %12 = vsyncpa [#allocation8], 0 }
   0x5   :  { %14 = vsyncpa [#allocation8 + $0x1], 0 }
   0x6   :  { %15 = vsyncpa [#allocation6], 0 }
   0x7   :  { %17 = vsyncpa [#allocation6 + $0x1], 0 }
   0x8   :  { %18 = vsyncpa [#allocation11], 0 }
   0x9   :  { %20 = vsyncpa [#allocation11 + $0x1], 0  ;;  %s957_s12 = smov 0   ;;  %s959_s13 = smov 0  }
   0xa   :  { %s961_s14 = smov 0   ;;  %s963_s15 = smov 0  }
   0xb   :  { %s965_s16 = smov 0   ;;  %s967_s17 = smov 0  }
   0xc LB: > { %s654_s18 = sadd.s32 4294967295, %s928_s17   ;;  %s655_s19 = sadd.s32 4294967294, %s928_s17   ;;  %s928_s17 = sphi %s967_s17, %s26_s17   ;;  %s924_s16 = sphi %s965_s16, %s1222_s16   ;;  %s920_s15 = sphi %s963_s15, %s1221_s15   ;;  %s916_s14 = sphi %s961_s14, %s1220_s14   ;;  %s912_s13 = sphi %s959_s13, %s1219_s13   ;;  %s908_s12 = sphi %s957_s12, %s1218_s12  }
   0xd   : > { %s45_s20 = sadd.s32 1, %s924_s16  ;;  %s56_s21 = sadd.s32 1, %s916_s14 }
   0xe   : > { %p47_p0 = scmp.ge.s32.totalorder %s45_s20, 2  ;;  %p63_p1 = scmp.ne.s32.totalorder %s916_s14, %s912_s13 }
   0xf   : > { %p64_p2 = scmp.eq.s32.totalorder %s928_s17, 0  ;;  %p69_p3 = scmp.ne.s32.totalorder %s912_s13, %s908_s12 }
  0x10   : > { %s1224_s20 = smov (%p47_p0, %s45_s20), 0  ;;  %p70_p5 = scmp.eq.s32.totalorder %s654_s18, 0 }
  0x11   : > { %p998_p4 = por %p64_p2, %p63_p1  ;;  %s51_s23 = ssub.s32 %s924_s16, %s1224_s20 }
  0x12   : > { %p123_p6 = scmp.eq.s32.totalorder %s654_s18, 1  ;;  %p54_p7 = scmp.eq.s32.totalorder %s51_s23, 0 }
  0x13   : > { %p1004_p8 = por %p70_p5, %p69_p3  ;;  %p129_p10 = scmp.eq.s32.totalorder %s655_s19, 1 }
  0x14   : > { %p1008_p9 = por %p123_p6, %p63_p1  ;;  %p657_p12 = scmp.ge.s32.totalorder %s928_s17, 2 }
  0x15   : > { %s1013_s26 = scalar_select %p54_p7, %s916_s14, %s56_s21  }
  0x16   : > { %p1015_p11 = por %p129_p10, %p69_p3  ;;  %p695_p13 = scmp.lt.s32.totalorder %s928_s17, 2 }
  0x17   : > { %s1022_s28 = sand.u32 1, %s916_s14   ;;  %s671_s30 = sshll.u32 %s924_s16, 7 }
  0x18   : > { %s658_s29 = sshll.u32 %s1022_s28, 3  ;;  %s1215_s0 = sld [smem:[#allocation16_spill]] }
  0x19   : > { %s179_s7 = scalar_lea.vmem [#allocation4], %s658_s29  ;;  %p1035_p0 = pnand %p695_p13, %p998_p4 }
  0x1a   : > { %s188_s8 = sshll.u32 %s179_s7, 4  ;;  %p664_p1 = scmp.ge.s32.totalorder %s928_s17, 1  ;;  %s189_s8 = int_to_ptr.vmem [resolvable:$true] %s188_s8 }
  0x1b   : > { %s176_s10 = scalar_lea.sflag [#allocation5], %s1022_s28  ;;  %p760_p2 = pneg %p1035_p0 }
  0x1c   : > { %s771_s11 = scalar_lea.vmem %s189_s8, 128  ;;  %s930_s18 = smov [#allocation4]  }
  0x1d   : > { %p772_p3 = scmp.ne.s32.totalorder %s189_s8, %s771_s11  ;;  %s776_s19 = sshll.u32 %s930_s18, 4  ;;  %s777_s19 = int_to_ptr.vmem [resolvable:$false] %s776_s19 }
  0x1e   : > { %s187_s6 = scalar_lea.hbm %s1215_s0, %s671_s30  ;;  %s778_s21 = scalar_lea.vmem %s777_s19, 256 }
  0x1f   : > { %p774_p5 = pnand %p772_p3, %p760_p2  ;;  %p779_p4 = scmp.lt.s32.totalorder %s189_s8, %s777_s19 }
  0x20   : > { %p780_p7 = scmp.lt.s32.totalorder %s778_s21, %s771_s11 }
  0x21   : > { %p775_p6 = pneg %p774_p5 }
  0x22   : > { %p781_p10 = por %p780_p7, %p779_p4 }
  0x24   : > { %p782_p13 = pnand %p781_p10, %p775_p6 }
  0x26   : > { %785 = shalt.err (!%p782_p13)
}
  0x27   : > { %s931_s22 = smov 32   ;;  %s932_s23 = smov 2  }
  0x28   : > { %684 = dma.hbm_to_vmem [thread:$0]  (!%p1035_p0), %s187_s6, 128, %s189_s8, %s176_s10, %s931_s22, %s931_s22, %s932_s23  }
  0x29   : > { %p219_p3 = scmp.lt.s32.totalorder %s928_s17, 3  ;;  %s210_s7 = scalar_lea.hbm %s1207_s1, %s671_s30 }
  0x2a   : > { %s202_s18 = scalar_lea.vmem [#allocation7], %s658_s29  ;;  %s199_s21 = scalar_lea.sflag [#allocation8], %s1022_s28 }
  0x2b   : > { %p1056_p5 = pnand %p664_p1, %p219_p3  ;;  %s211_s19 = sshll.u32 %s202_s18, 4  ;;  %s212_s19 = int_to_ptr.vmem [resolvable:$true] %s211_s19 }
  0x2c   : > { %s799_s0 = scalar_lea.vmem %s212_s19, 128  ;;  %s933_s6 = smov [#allocation7]  }
  0x2d   : > { %p800_p6 = scmp.ne.s32.totalorder %s212_s19, %s799_s0  ;;  %s804_s8 = sshll.u32 %s933_s6, 4  ;;  %s805_s8 = int_to_ptr.vmem [resolvable:$false] %s804_s8 }
  0x2e   : > { %s806_s30 = scalar_lea.vmem %s805_s8, 256  ;;  %p807_p10 = scmp.lt.s32.totalorder %s212_s19, %s805_s8 }
  0x2f   : > { %p802_p4 = pnand %p800_p6, %p760_p2  ;;  %p808_p1 = scmp.lt.s32.totalorder %s806_s30, %s799_s0 }
  0x31   : > { %p803_p7 = pneg %p802_p4  ;;  %p809_p13 = por %p808_p1, %p807_p10 }
  0x33   : > { %p810_p3 = pnand %p809_p13, %p803_p7 }
  0x35   : > { %813 = shalt.err (!%p810_p3)
}
  0x36   : > { %687 = dma.hbm_to_vmem [thread:$0]  (!%p1035_p0), %s210_s7, 128, %s212_s19, %s199_s21, %s931_s22, %s931_s22, %s932_s23  }
  0x37   : > { %223 = sbr.rel (%p1056_p5) target bundleno = 457 (0x1c9), region = 28  ;;  %s1071_s28 = sand.u32 (!%p1056_p5), 1, %s912_s13  }
  0x38   : > { %s665_s29 = sshll.u32 (!%p1056_p5), %s1071_s28, 3  ;;  %s226_s10 = scalar_lea.sflag (!%p1056_p5), [#allocation5], %s1071_s28 }
  0x39   : > { %s229_s4 = scalar_lea.vmem (!%p1056_p5), [#allocation4], %s665_s29 }
  0x3c   : > { %891 = dma.done.wait (%p1004_p8), %s226_s10, 128  }
  0x3d   : > { %893 = vsyncadd (%p1004_p8), %s226_s10, 4294967168  ;;  %s235_s0 = scalar_lea.sflag [#allocation8], %s1071_s28  ;;  %s1080_s9 = scalar_lea.vmem [#allocation7], %s665_s29 }
  0x3e   : > { %895 = dma.done.wait (%p1004_p8), %s235_s0, 128  }
  0x3f   : > { %897 = vsyncadd (%p1004_p8), %s235_s0, 4294967168  ;;  %v934_v0 = vmov 0.0   ;;  %vm309_vm0 = vcmask 1041408   ;;  %v285_v1 = vld [vmem:[%s229_s4] sm:$0x3]  ;;  %vm421_vm5 = vcmask 1041409  }
  0x40   : > { %277 = vst [vmem:[#allocation2] sm:$0x3] %v934_v0  ;;  %278 = vst [vmem:[#allocation2 + $0x2] sm:$0x3] %v934_v0  ;;  %v286_v2 = vld [vmem:[%s229_s4 + $0x2] sm:$0x3] }
  0x41   : > { %279 = vst [vmem:[#allocation2 + $0x4] sm:$0x3] %v934_v0  ;;  %280 = vst [vmem:[#allocation2 + $0x6] sm:$0x3] %v934_v0  ;;  %v287_v3 = vld [vmem:[%s229_s4 + $0x4] sm:$0x3] }
  0x42   : > { %281 = vst [vmem:[#allocation3] sm:$0x3] %v934_v0  ;;  %282 = vst [vmem:[#allocation3 + $0x2] sm:$0x3] %v934_v0  ;;  %v288_v4 = vld [vmem:[%s229_s4 + $0x6] sm:$0x3] }
  0x43   : > { %283 = vst [vmem:[#allocation3 + $0x4] sm:$0x3] %v934_v0  ;;  %284 = vst [vmem:[#allocation3 + $0x6] sm:$0x3] %v934_v0  ;;  %v310_v5 = vsel %vm309_vm0, %v285_v1, -inf  ;;  %v311_v6 = vsel %vm309_vm0, %v286_v2, -inf }
  0x44   : > { %v312_v7 = vsel %vm309_vm0, %v287_v3, -inf  ;;  %v313_v8 = vsel %vm309_vm0, %v288_v4, -inf  ;;  %v314_v9 = vmax.f32 %v310_v5, %v311_v6  ;;  %v289_v31 = vld [vmem:[%s1080_s9] sm:$0x3]  ;;  %v290_v32 = vld [vmem:[%s1080_s9 + $0x2] sm:$0x3] }
  0x45   : > { %v315_v10 = vmax.f32 %v312_v7, %v313_v8  ;;  %v291_v33 = vld [vmem:[%s1080_s9 + $0x4] sm:$0x3]  ;;  %v292_v34 = vld [vmem:[%s1080_s9 + $0x6] sm:$0x3]  ;;  %v297_v35 = vfloor.f32 %v289_v31  ;;  %v301_v36 = vceil.f32 %v289_v31  ;;  %v298_v37 = vfloor.f32 %v290_v32  ;;  %s667_s24 = sshll.u32 %s920_s15, 4  ;;  %s262_s22 = scalar_lea.vmem [#allocation9], %s1071_s28 }
  0x46   : > { %v302_v38 = vceil.f32 %v290_v32  ;;  %vm293_vm1 = vcmp.ge.f32.partialorder %v289_v31, 0.0  ;;  %vm294_vm2 = vcmp.ge.f32.partialorder %v290_v32, 0.0  ;;  %v299_v39 = vfloor.f32 %v291_v33  ;;  %s507_s23 = sshll.u32 %s262_s22, 4  ;;  %s268_s5 = scalar_lea.vmem [#allocation10], %s1071_s28  ;;  %s1127_s23 = int_to_ptr.vmem [resolvable:$true] %s507_s23 }
  0x47   : > { %v316_v11 = vmax.f32 %v314_v9, %v315_v10  ;;  %v303_v40 = vceil.f32 %v291_v33  ;;  %v300_v41 = vfloor.f32 %v292_v34  ;;  %v304_v42 = vceil.f32 %v292_v34  ;;  %v341_v54 = vld [vmem:[#allocation2] sm:$0x3]  ;;  %v342_v55 = vld [vmem:[#allocation2 + $0x2] sm:$0x3]  ;;  %s520_s7 = sshll.u32 %s268_s5, 4  ;;  %s1125_s19 = scalar_lea.hbm %s1208_s2, %s667_s24  ;;  %s1136_s7 = int_to_ptr.vmem [resolvable:$true] %s520_s7 }
  0x48   : > { %vm295_vm3 = vcmp.ge.f32.partialorder %v291_v33, 0.0  ;;  %vm296_vm4 = vcmp.ge.f32.partialorder %v292_v34, 0.0  ;;  %v305_v43 = vsel %vm293_vm1, %v297_v35, %v301_v36  ;;  %v306_v44 = vsel %vm294_vm2, %v298_v37, %v302_v38  ;;  %v343_v62 = vld [vmem:[#allocation2 + $0x4] sm:$0x3]  ;;  %v344_v63 = vld [vmem:[#allocation2 + $0x6] sm:$0x3]  ;;  %s1134_s6 = scalar_lea.hbm %s1209_s3, %s667_s24 }
  0x49   : > { %v317_v12 = vsub.f32 %v285_v1, %v316_v11  ;;  %v318_v13 = vsub.f32 %v286_v2, %v316_v11  ;;  %v319_v14 = vsub.f32 %v287_v3, %v316_v11  ;;  %v320_v15 = vsub.f32 %v288_v4, %v316_v11  ;;  %v357_v0 = vld [vmem:[#allocation3] sm:$0x3]  ;;  %v358_v1 = vld [vmem:[#allocation3 + $0x2] sm:$0x3]  ;;  %s491_s8 = scalar_lea.sflag [#allocation6], %s1071_s28  ;;  %s814_s30 = scalar_lea.vmem %s1127_s23, 16 }
  0x4a   : > { %v307_v45 = vsel %vm295_vm3, %v299_v39, %v303_v40  ;;  %v308_v46 = vsel %vm296_vm4, %v300_v41, %v304_v42  ;;  %v365_v48 = vmul.f32 %v305_v43, %v305_v43  ;;  %v366_v49 = vmul.f32 %v306_v44, %v306_v44  ;;  %v359_v10 = vld [vmem:[#allocation3 + $0x4] sm:$0x3]  ;;  %v360_v11 = vld [vmem:[#allocation3 + $0x6] sm:$0x3]  ;;  %p815_p8 = scmp.ne.s32.totalorder %s1127_s23, %s814_s30  ;;  %s935_s29 = smov [#allocation9]  }
  0x4b   : > { %v321_v16 = vmul.f32 1.442695, %v317_v12  ;;  %v323_v17 = vmul.f32 1.442695, %v318_v13  ;;  %v325_v18 = vmul.f32 1.442695, %v319_v14  ;;  %v367_v56 = vmul.f32 %v307_v45, %v307_v45 }
  0x4c   : > { %v327_v19 = vmul.f32 1.442695, %v320_v15  ;;  %v368_v57 = vmul.f32 %v308_v46, %v308_v46  ;;  %v403_v36 = vlaneseq  ;;  %vm423_vm6 = vcmask 1042434   ;;  %p816_p0 = pnand %p815_p8, %p1008_p9  ;;  %s818_s10 = sshll.u32 %s935_s29, 4  ;;  %s819_s10 = int_to_ptr.vmem [resolvable:$false] %s818_s10 }
  0x4d   : > { %748 = vpow2.f32 %v321_v16  ;;  %vm425_vm7 = vcmask 1043459   ;;  %vm428_vm8 = vcmask 11264   ;;  %vm481_vm9 = vcmask 24576   ;;  %s820_s4 = scalar_lea.vmem %s819_s10, 32  ;;  %p821_p5 = scmp.lt.s32.totalorder %s1127_s23, %s819_s10 }
  0x4e   : > { %750 = vpow2.f32 %v323_v17  ;;  %v404_v39 = vand.u32 127, %v403_v36  ;;  %v406_v40 = vshrl.u32 %v403_v36, 7  ;;  %p817_p2 = pneg %p816_p0  ;;  %p822_p6 = scmp.lt.s32.totalorder %s820_s4, %s814_s30 }
  0x4f   : > { %752 = vpow2.f32 %v325_v18 }
  0x50   : > { %754 = vpow2.f32 %v327_v19  ;;  %p823_p4 = por %p822_p6, %p821_p5 }
  0x52   : > { %p824_p7 = pnand %p823_p4, %p817_p2 }
  0x5a   : > { %v749_v20 = vpop.eup %748 }
  0x5b   : > { %v751_v21 = vpop.eup %750  ;;  %v329_v22 = vsel %vm309_vm0, %v749_v20, 0.0 }
  0x5c   : > { %v753_v23 = vpop.eup %752  ;;  %v330_v24 = vsel %vm309_vm0, %v751_v21, 0.0 }
  0x5d   : > { %v755_v25 = vpop.eup %754  ;;  %v331_v26 = vadd.f32 %v330_v24, %v329_v22  ;;  %v332_v27 = vsel %vm309_vm0, %v753_v23, 0.0 }
  0x5e   : > { %v334_v28 = vsel %vm309_vm0, %v755_v25, 0.0 }
  0x5f   : > { %v333_v29 = vadd.f32 %v332_v27, %v331_v26 }
  0x61   : > { %v335_v30 = vadd.f32 %v334_v28, %v333_v29 }
  0x63   : > { %756 = vrcp.f32 %v335_v30 }
  0x70   : > { %v757_v47 = vpop.eup %756 }
  0x71   : > { %v337_v50 = vmul.f32 %v757_v47, %v749_v20  ;;  %v338_v51 = vmul.f32 %v757_v47, %v751_v21  ;;  %v339_v52 = vmul.f32 %v757_v47, %v753_v23  ;;  %v340_v53 = vmul.f32 %v757_v47, %v755_v25 }
  0x73   : > { %v345_v58 = vmul.f32 %v337_v50, %v305_v43  ;;  %v361_v59 = vmul.f32 %v337_v50, %v337_v50  ;;  %v346_v60 = vmul.f32 %v338_v51, %v306_v44  ;;  %v362_v61 = vmul.f32 %v338_v51, %v338_v51 }
  0x74   : > { %v347_v2 = vmul.f32 %v339_v52, %v307_v45  ;;  %v363_v3 = vmul.f32 %v339_v52, %v339_v52  ;;  %v348_v4 = vmul.f32 %v340_v53, %v308_v46  ;;  %v364_v5 = vmul.f32 %v340_v53, %v340_v53 }
  0x75   : > { %v349_v6 = vadd.f32 %v345_v58, %v341_v54  ;;  %v369_v7 = vadd.f32 %v365_v48, %v361_v59  ;;  %v350_v8 = vadd.f32 %v346_v60, %v342_v55  ;;  %v370_v9 = vadd.f32 %v366_v49, %v362_v61 }
  0x76   : > { %v351_v12 = vadd.f32 %v347_v2, %v343_v62  ;;  %v371_v13 = vadd.f32 %v367_v56, %v363_v3  ;;  %v352_v14 = vadd.f32 %v348_v4, %v344_v63  ;;  %v372_v15 = vadd.f32 %v368_v57, %v364_v5 }
  0x77   : > { %353 = vst [vmem:[#allocation2] sm:$0x3] %v349_v6  ;;  %v373_v16 = vadd.f32 %v369_v7, %v357_v0  ;;  %354 = vst [vmem:[#allocation2 + $0x2] sm:$0x3] %v350_v8  ;;  %v374_v17 = vadd.f32 %v370_v9, %v358_v1  ;;  %v1106_v43 = vsub.s32 %v404_v39, %v406_v40 }
  0x78   : > { %355 = vst [vmem:[#allocation2 + $0x4] sm:$0x3] %v351_v12  ;;  %v375_v18 = vadd.f32 %v371_v13, %v359_v10  ;;  %356 = vst [vmem:[#allocation2 + $0x6] sm:$0x3] %v352_v14  ;;  %v376_v19 = vadd.f32 %v372_v15, %v360_v11 }
  0x79   : > { %377 = vst [vmem:[#allocation3] sm:$0x3] %v373_v16  ;;  %378 = vst [vmem:[#allocation3 + $0x2] sm:$0x3] %v374_v17 }
  0x7a   : > { %379 = vst [vmem:[#allocation3 + $0x4] sm:$0x3] %v375_v18  ;;  %380 = vst [vmem:[#allocation3 + $0x6] sm:$0x3] %v376_v19 }
  0x7e   : > { %v383_v20 = vld [vmem:[#allocation2] sm:$0x3]  ;;  %v384_v21 = vld [vmem:[#allocation2 + $0x2] sm:$0x3] }
  0x7f   : > { %v387_v22 = vsel %vm309_vm0, %v383_v20, 0.0  ;;  %v390_v26 = vsel %vm309_vm0, %v384_v21, 0.0  ;;  %v385_v27 = vld [vmem:[#allocation2 + $0x4] sm:$0x3]  ;;  %v386_v31 = vld [vmem:[#allocation2 + $0x6] sm:$0x3] }
  0x80   : > { %388 = vadd.xlane.f32.xlu0 %v387_v22  ;;  %v432_v23 = vld [vmem:[#allocation3] sm:$0x3]  ;;  %v433_v24 = vld [vmem:[#allocation3 + $0x2] sm:$0x3]  ;;  %v393_v30 = vsel %vm309_vm0, %v385_v27, 0.0  ;;  %v396_v34 = vsel %vm309_vm0, %v386_v31, 0.0 }
  0x81   : > { %v436_v25 = vsel %vm309_vm0, %v432_v23, 0.0  ;;  %v439_v28 = vsel %vm309_vm0, %v433_v24, 0.0  ;;  %v434_v29 = vld [vmem:[#allocation3 + $0x4] sm:$0x3]  ;;  %v435_v33 = vld [vmem:[#allocation3 + $0x6] sm:$0x3] }
  0x82   : > { %437 = vadd.xlane.f32.xlu1 %v436_v25  ;;  %v442_v32 = vsel %vm309_vm0, %v434_v29, 0.0  ;;  %v445_v35 = vsel %vm309_vm0, %v435_v33, 0.0 }
  0x84   : > { %391 = vadd.xlane.f32.xlu0 %v390_v26 }
  0x86   : > { %440 = vadd.xlane.f32.xlu1 %v439_v28 }
  0x88   : > { %394 = vadd.xlane.f32.xlu0 %v393_v30 }
  0x8a   : > { %443 = vadd.xlane.f32.xlu1 %v442_v32 }
  0x8c   : > { %397 = vadd.xlane.f32.xlu0 %v396_v34 }
  0x8e   : > { %446 = vadd.xlane.f32.xlu1 %v445_v35 }
 0x109   : > { %v389_v37 = vpop.xlane.xlu0 %388 }
 0x10a   : > { %v408_v48 = vrot.slane %v389_v37, %v1106_v43 }
 0x10b   : > { %v438_v38 = vpop.xlane.xlu1 %437 }
 0x10c   : > { %v455_v52 = vrot.slane %v438_v38, %v1106_v43 }
 0x10d   : > { %v392_v41 = vpop.xlane.xlu0 %391 }
 0x10e   : > { %v412_v45 = vrot.slane %v392_v41, %v1106_v43 }
 0x10f   : > { %v441_v42 = vpop.xlane.xlu1 %440 }
 0x110   : > { %v459_v49 = vrot.slane %v441_v42, %v1106_v43  ;;  %v422_v53 = vsel %vm421_vm5, %v412_v45, %v408_v48 }
 0x111   : > { %v395_v44 = vpop.xlane.xlu0 %394 }
 0x112   : > { %v416_v46 = vrot.slane %v395_v44, %v1106_v43  ;;  %v468_v57 = vsel %vm421_vm5, %v459_v49, %v455_v52 }
 0x113   : > { %v444_v47 = vpop.xlane.xlu1 %443 }
 0x114   : > { %v463_v50 = vrot.slane %v444_v47, %v1106_v43  ;;  %v424_v56 = vsel %vm423_vm6, %v416_v46, %v422_v53 }
 0x115   : > { %v398_v51 = vpop.xlane.xlu0 %397 }
 0x116   : > { %v420_v54 = vrot.slane %v398_v51, %v1106_v43  ;;  %v469_v61 = vsel %vm423_vm6, %v463_v50, %v468_v57 }
 0x117   : > { %v447_v55 = vpop.xlane.xlu1 %446 }
 0x118   : > { %v467_v58 = vrot.slane %v447_v55, %v1106_v43  ;;  %v426_v59 = vsel %vm425_vm7, %v420_v54, %v424_v56 }
 0x119   : > { %v429_v60 = vsel %vm428_vm8, %v426_v59, 0.0 }
 0x11a   : > { %430 = vadd.xlane.f32.xlu0 %v429_v60  ;;  %v470_v62 = vsel %vm425_vm7, %v467_v58, %v469_v61 }
 0x11b   : > { %v472_v63 = vsel %vm428_vm8, %v470_v62, 0.0 }
 0x11c   : > { %473 = vadd.xlane.f32.xlu1 %v472_v63 }
 0x1a3   : > { %v431_v0 = vpop.xlane.xlu0 %430 }
 0x1a4   : > { %v479_v1 = vrot.slane %v431_v0, %v1106_v43 }
 0x1a5   : > { %v474_v2 = vpop.xlane.xlu1 %473 }
 0x1a6   : > { %v487_v3 = vrot.slane %v474_v2, %v1106_v43  ;;  %482 = vst.msk [vmem:[%s262_s22] sm:$0x1] %vm481_vm9, %v479_v1 }
 0x1a7   : > { %827 = shalt.err (!%p824_p7)
}
 0x1a8   : > { %s828_s0 = scalar_lea.hbm %s1125_s19, 16  ;;  %s832_s22 = scalar_lea.hbm %s1208_s2, 32 }
 0x1a9   : > { %p829_p10 = scmp.ne.s32.totalorder %s1125_s19, %s828_s0  ;;  %p833_p3 = scmp.lt.s32.totalorder %s1125_s19, %s1208_s2 }
 0x1aa   : > { %p834_p8 = scmp.lt.s32.totalorder %s832_s22, %s828_s0 }
 0x1ab   : > { %p830_p1 = pnand %p829_p10, %p1008_p9 }
 0x1ac   : > { %p835_p0 = por %p834_p8, %p833_p3 }
 0x1ad   : > { %p831_p13 = pneg %p830_p1 }
 0x1af   : > { %p836_p2 = pnand %p835_p0, %p831_p13 }
 0x1b1   : > { %839 = shalt.err (!%p836_p2)
}
 0x1b2   : > { %677 = dma.vmem_to_hbm [thread:$0]  (%p1008_p9), %s1127_s23, 16, %s1125_s19, %s491_s8   ;;  %489 = vst.msk [vmem:[%s268_s5] sm:$0x1] %vm481_vm9, %v487_v3 }
 0x1b3   : > { %s495_s15 = scalar_lea.sflag [#allocation11], %s1071_s28  ;;  %s840_s21 = scalar_lea.vmem %s1136_s7, 16 }
 0x1b4   : > { %p841_p5 = scmp.ne.s32.totalorder %s1136_s7, %s840_s21  ;;  %s936_s30 = smov [#allocation10]  }
 0x1b5   : > { %s844_s29 = sshll.u32 %s936_s30, 4  ;;  %s845_s29 = int_to_ptr.vmem [resolvable:$false] %s844_s29 }
 0x1b6   : > { %p842_p6 = pnand %p841_p5, %p1008_p9  ;;  %s846_s10 = scalar_lea.vmem %s845_s29, 32 }
 0x1b7   : > { %p847_p7 = scmp.lt.s32.totalorder %s1136_s7, %s845_s29  ;;  %p848_p10 = scmp.lt.s32.totalorder %s846_s10, %s840_s21 }
 0x1b8   : > { %p843_p4 = pneg %p842_p6 }
 0x1b9   : > { %p849_p1 = por %p848_p10, %p847_p7 }
 0x1bb   : > { %p850_p13 = pnand %p849_p1, %p843_p4 }
 0x1bd   : > { %853 = shalt.err (!%p850_p13)
}
 0x1be   : > { %s854_s23 = scalar_lea.hbm %s1134_s6, 16  ;;  %s858_s19 = scalar_lea.hbm %s1209_s3, 32 }
 0x1bf   : > { %p855_p3 = scmp.ne.s32.totalorder %s1134_s6, %s854_s23  ;;  %p859_p2 = scmp.lt.s32.totalorder %s1134_s6, %s1209_s3 }
 0x1c0   : > { %p860_p5 = scmp.lt.s32.totalorder %s858_s19, %s854_s23 }
 0x1c1   : > { %p856_p8 = pnand %p855_p3, %p1008_p9 }
 0x1c2   : > { %p861_p6 = por %p860_p5, %p859_p2 }
 0x1c3   : > { %p857_p0 = pneg %p856_p8 }
 0x1c5   : > { %p862_p4 = pnand %p861_p6, %p857_p0 }
 0x1c7   : > { %865 = shalt.err (!%p862_p4)
}
 0x1c8   : > { %678 = dma.vmem_to_hbm [thread:$0]  (%p1008_p9), %s1136_s7, 16, %s1134_s6, %s495_s15  }
 0x1c9 PF: > { %s532_s0 = sand.u32 1, %s908_s12   ;;  %p689_p7 = pnand %p657_p12, %p1015_p11 }
 0x1ca   : > { %s533_s9 = scalar_lea.sflag [#allocation6], %s532_s0 }
 0x1cb   : > { %p690_p10 = pneg %p689_p7 }
 0x1cd   : > { %899 = dma.done.wait (%p690_p10), %s533_s9, 16  }
 0x1ce   : > { %901 = vsyncadd (%p690_p10), %s533_s9, 4294967280  ;;  %s541_s24 = scalar_lea.sflag [#allocation11], %s532_s0 }
 0x1cf   : > { %903 = dma.done.wait (%p690_p10), %s541_s24, 16  }
 0x1d0   : > { %905 = vsyncadd (%p690_p10), %s541_s24, 4294967280  ;;  %s26_s17 = sadd.s32 1, %s928_s17   ;;  %s1218_s12 = smov %s912_s13 }
 0x1d1   : > { %p23_p1 = scmp.ge.s32.totalorder %s26_s17, 4   ;;  %s1219_s13 = smov %s916_s14 }
 0x1d2   : > { %s1220_s14 = smov %s1013_s26  ;;  %s1221_s15 = smov %s924_s16 }
 0x1d3   : > { %s1222_s16 = smov %s1224_s20  ;;  %25 = sbr.rel (!%p23_p1) target bundleno = 12 (0xc), region = 111 }
 0x1d8   :  { %545 = vsyncpa [#allocation5], 1 }
 0x1d9   :  { %547 = vsyncpa [#allocation5 + $0x1], 1 }
 0x1da   :  { %548 = vsyncpa [#allocation8], 1 }
 0x1db   :  { %550 = vsyncpa [#allocation8 + $0x1], 1 }
 0x1dc   :  { %551 = vsyncpa [#allocation6], 1 }
 0x1dd   :  { %553 = vsyncpa [#allocation6 + $0x1], 1 }
 0x1de   :  { %554 = vsyncpa [#allocation11], 1 }
 0x1df   :  { %556 = vsyncpa [#allocation11 + $0x1], 1 }

</bundles_post_ra>
